<compile_context>
chip_gen: v7x
topology: tpu7x:2x2x1
jax: 0.10.0
libtpu: 0.0.40
codegen_flags: <defaults>
</compile_context>

<pallas_src>
import numpy as np
import jax
import jax.numpy as jnp
from jax.experimental import pallas as pl
from jax.experimental.pallas import tpu as pltpu


def make_positional_encoding(d_model: int, max_len: int) -> jnp.ndarray:
    """Builds the (1, max_len, d_model) sinusoidal table exactly like the torch code."""
    position = np.arange(max_len, dtype=np.float32)[:, None]                    # (max_len, 1)
    div_term = np.exp(np.arange(0, d_model, 2, dtype=np.float32)
                      * (-np.log(10000.0) / d_model))                           # (ceil(d/2),)
    pe = np.zeros((1, max_len, d_model), dtype=np.float32)
    pe[0, :, 0::2] = np.sin(position * div_term)
    # cos fills floor(d/2) columns; truncate div_term explicitly (torch reference
    # only supports even d_model: 82/256/512/1024).
    pe[0, :, 1::2] = np.cos(position * div_term[: d_model // 2])
    return jnp.asarray(pe)


def _pos_enc_kernel(scale_ref, x_ref, pe_ref, o_ref):
    # scale_ref: (1,) f32 in SMEM; x_ref / pe_ref / o_ref: identically shaped VMEM tiles.
    scale = scale_ref[0]
    o_ref[...] = (x_ref[...].astype(jnp.float32)
                  + scale * pe_ref[...].astype(jnp.float32)).astype(o_ref.dtype)


def _choose_row_tile(S: int, D: int, itemsize: int, target_tile_bytes: int) -> int:
    """Largest multiple-of-8 divisor of S whose (rows, D) tile is <= target bytes."""
    assert S % 8 == 0
    rows_per_target = max(8, (target_tile_bytes // max(1, D * itemsize)) // 8 * 8)
    ts = min(S, rows_per_target)
    while S % ts:
        ts -= 8
    return ts


def positional_encoding_sum(x: jnp.ndarray, pe: jnp.ndarray, scale_factor: jnp.ndarray,
                            *, target_tile_bytes: int = 2 << 20) -> jnp.ndarray:
    """x: (B, S, D); pe: (1, max_len, D) f32; scale_factor: (1,) f32. Returns (B, S, D)."""
    B, S, D = x.shape
    itemsize = jnp.dtype(x.dtype).itemsize
    pe_s = pe[0, :S, :].astype(x.dtype)            # (S, D) -- static slice, glue outside kernel
    scale_factor = scale_factor.astype(jnp.float32)

    if S % 8 == 0:
        # Lane-dense 2-D path: flatten to (B*S, D), row-tiled.
        ts = _choose_row_tile(S, D, itemsize, target_tile_bytes)
        nst = S // ts                               # sequence tiles per batch element
        x2 = x.reshape(B * S, D)

        out2 = pl.pallas_call(
            _pos_enc_kernel,
            out_shape=jax.ShapeDtypeStruct((B * S, D), x.dtype),
            grid_spec=pltpu.PrefetchScalarGridSpec(
                num_scalar_prefetch=0,
                # b is the innermost (fastest) grid dim: pe's block index is constant
                # across it, so Pallas skips re-DMAing pe for every batch element.
                grid=(nst, B),
                in_specs=[
                    # scale_factor lives in SMEM (scalar parameter).
                    pl.BlockSpec(memory_space=pltpu.MemorySpace.SMEM),
                    # x rows for batch b, sequence-tile s.
                    pl.BlockSpec((ts, D), lambda s, b: (b * nst + s, 0)),
                    # pe is batch-invariant: block index depends only on s.
                    pl.BlockSpec((ts, D), lambda s, b: (s, 0)),
                ],
                out_specs=pl.BlockSpec((ts, D), lambda s, b: (b * nst + s, 0)),
            ),
            compiler_params=pltpu.CompilerParams(
                dimension_semantics=("parallel", "parallel")),
            # Optional: input_output_aliases={1: 0} if the caller no longer needs x.
        )(scale_factor, x2, pe_s)
        return out2.reshape(B, S, D)

    # Fallback (S not a multiple of 8): full (S, D) block per batch element.
    # Block dims equal the full array extents, so the layout is always legal;
    # pe's block index is constant over the whole grid -> fetched once.
    pe3 = pe_s[None]                                # (1, S, D)
    return pl.pallas_call(
        _pos_enc_kernel,
        out_shape=jax.ShapeDtypeStruct((B, S, D), x.dtype),
        grid_spec=pltpu.PrefetchScalarGridSpec(
            num_scalar_prefetch=0,
            grid=(B,),
            in_specs=[
                pl.BlockSpec(memory_space=pltpu.MemorySpace.SMEM),
                pl.BlockSpec((1, S, D), lambda b: (b, 0, 0)),
                pl.BlockSpec((1, S, D), lambda b: (0, 0, 0)),
            ],
            out_specs=pl.BlockSpec((1, S, D), lambda b: (b, 0, 0)),
        ),
        compiler_params=pltpu.CompilerParams(dimension_semantics=("parallel",)),
    )(scale_factor, x, pe3)


if __name__ == "__main__":
    # Small shapes consistent with the module's forward: (batch, seq, d_model).
    B, S, D = 2, 8, 32
    MAX_LEN = 16

    key = jax.random.PRNGKey(0)
    x = jax.random.normal(key, (B, S, D), dtype=jnp.float32)

    # Deterministic parameter init, matching nn.Parameter(torch.FloatTensor([1e-05])).
    scale_factor = jnp.array([1e-05], dtype=jnp.float32)
    pe = make_positional_encoding(D, MAX_LEN)

    # Main (lane-dense, row-tiled) path.
    out = jax.block_until_ready(positional_encoding_sum(x, pe, scale_factor))
    ref = x + scale_factor[0] * pe[:, :S, :]
    np.testing.assert_allclose(np.asarray(out), np.asarray(ref), rtol=1e-6, atol=1e-6)

    # Fallback path (S not a multiple of 8).
    S2 = 6
    x2 = jax.random.normal(jax.random.PRNGKey(1), (B, S2, D), dtype=jnp.float32)
    out2 = jax.block_until_ready(positional_encoding_sum(x2, pe, scale_factor))
    ref2 = x2 + scale_factor[0] * pe[:, :S2, :]
    np.testing.assert_allclose(np.asarray(out2), np.asarray(ref2), rtol=1e-6, atol=1e-6)

    print("KERNEL_OK")
</pallas_src>

<mosaic_0001>
module attributes {stable_mosaic.version = 11 : i64} {
  func.func @_pos_enc_kernel(%arg0: i32, %arg1: i32, %arg2: memref<1xf32, #tpu.memory_space<smem>>, %arg3: memref<8x32xf32, #tpu.memory_space<vmem>>, %arg4: memref<8x32xf32, #tpu.memory_space<vmem>>, %arg5: memref<8x32xf32, #tpu.memory_space<vmem>>) attributes {dimension_semantics = [#tpu.dimension_semantics<parallel>, #tpu.dimension_semantics<parallel>], iteration_bounds = array<i64: 1, 2>, scalar_prefetch = 0 : i64, scratch_operands = 0 : i64, tpu.core_type = #tpu.core_type<tc>, window_params = [{transform_indices = @transform_0, window_bounds = array<i64: 1>}, {transform_indices = @transform_1, window_bounds = array<i64: 8, 32>}, {transform_indices = @transform_2, window_bounds = array<i64: 8, 32>}, {transform_indices = @transform_3, window_bounds = array<i64: 8, 32>}]} {
    %c0 = arith.constant 0 : index
    %0 = memref.load %arg2[%c0] : memref<1xf32, #tpu.memory_space<smem>>
    %c0_0 = arith.constant 0 : index
    %c0_1 = arith.constant 0 : index
    %1 = vector.load %arg3[%c0_0, %c0_1] : memref<8x32xf32, #tpu.memory_space<vmem>>, vector<8x32xf32>
    %c0_2 = arith.constant 0 : index
    %c0_3 = arith.constant 0 : index
    %2 = vector.load %arg4[%c0_2, %c0_3] : memref<8x32xf32, #tpu.memory_space<vmem>>, vector<8x32xf32>
    %3 = vector.broadcast %0 : f32 to vector<8x32xf32>
    %4 = arith.mulf %3, %2 : vector<8x32xf32>
    %5 = arith.addf %1, %4 : vector<8x32xf32>
    %c0_4 = arith.constant 0 : index
    %c0_5 = arith.constant 0 : index
    %6 = vector.load %arg5[%c0_4, %c0_5] : memref<8x32xf32, #tpu.memory_space<vmem>>, vector<8x32xf32>
    tpu.vector_store %arg5[%c0_4, %c0_5], %5 {strides = array<i32>} : memref<8x32xf32, #tpu.memory_space<vmem>>, vector<8x32xf32>,
    return
  }
  func.func @transform_0(%arg0: i32, %arg1: i32) -> i32 {
    %c0_i32 = arith.constant 0 : i32
    %c0_i32_0 = arith.constant 0 : i32
    return %c0_i32 : i32
  }
  func.func @transform_1(%arg0: i32, %arg1: i32) -> (i32, i32) {
    %c1_i32 = arith.constant 1 : i32
    %0 = arith.muli %arg1, %c1_i32 : i32
    %1 = arith.addi %0, %arg0 : i32
    %c0_i32 = arith.constant 0 : i32
    %c0_i32_0 = arith.constant 0 : i32
    return %1, %c0_i32 : i32, i32
  }
  func.func @transform_2(%arg0: i32, %arg1: i32) -> (i32, i32) {
    %c0_i32 = arith.constant 0 : i32
    %c0_i32_0 = arith.constant 0 : i32
    return %arg0, %c0_i32 : i32, i32
  }
  func.func @transform_3(%arg0: i32, %arg1: i32) -> (i32, i32) {
    %c1_i32 = arith.constant 1 : i32
    %0 = arith.muli %arg1, %c1_i32 : i32
    %1 = arith.addi %0, %arg0 : i32
    %c0_i32 = arith.constant 0 : i32
    %c0_i32_0 = arith.constant 0 : i32
    return %1, %c0_i32 : i32, i32
  }
}

</mosaic_0001>

<bundles_post_ra>
// kernel: tpu_custom_call.1
= control target key start
LH: loop header
LB: loop body
LE: loop exit
PB: predicated region body
PF: predicated region fallthrough
CT: control target
= control target key end

     0   :  { %s817_s0 = inlined_call_operand.<no memory space> [shape: f32[1], index: 0, kind: input, shape index: {}]   ;;  %s818_s1 = inlined_call_operand.hbm [shape: f32[16,32], index: 1, kind: input, shape index: {}]   ;;  %s819_s2 = inlined_call_operand.hbm [shape: f32[8,32], index: 2, kind: input, shape index: {}]   ;;  %s820_s3 = inlined_call_operand.hbm [shape: f32[16,32], index: 3, kind: output, shape index: {}]  }
   0x1   :  { %8 = sst [smem:[#allocation2]] %s817_s0 }
   0x2   :  { %9 = vsyncpa [#allocation4], 0 }
   0x3   :  { %11 = vsyncpa [#allocation4 + $0x1], 0 }
   0x4   :  { %12 = vsyncpa [#allocation7], 0 }
   0x5   :  { %13 = vsyncpa [#allocation5], 0 }
   0x6   :  { %15 = vsyncpa [#allocation5 + $0x1], 0  ;;  %s601_s14 = smov 0   ;;  %s603_s15 = smov 0  }
   0x7   :  { %s605_s16 = smov 0   ;;  %s607_s17 = smov 0  }
   0x8   :  { %s609_s18 = smov 0   ;;  %s611_s19 = smov 0  }
   0x9 LB: > { %s341_s0 = sadd.s32 4294967295, %s573_s19   ;;  %s342_s20 = sadd.s32 4294967294, %s573_s19   ;;  %s573_s19 = sphi %s611_s19, %s21_s19   ;;  %s569_s18 = sphi %s609_s18, %s845_s18   ;;  %s565_s17 = sphi %s607_s17, %s844_s17   ;;  %s561_s16 = sphi %s605_s16, %s843_s16   ;;  %s557_s15 = sphi %s603_s15, %s842_s15   ;;  %s553_s14 = sphi %s601_s14, %s841_s14  }
   0xa   : > { %p76_p0 = scmp.ne.s32.totalorder %s557_s15, %s553_s14  ;;  %p635_p1 = scmp.eq.s32.totalorder %s341_s0, 0 }
   0xb   : > { %p639_p2 = scmp.eq.s32.totalorder %s341_s0, 1  ;;  %p134_p3 = scmp.eq.s32.totalorder %s342_s20, 1 }
   0xc   : > { %s825_s21 = scalar_select %p635_p1, 1, 0 }
   0xd   : > { %s826_s22 = scalar_select %p639_p2, 1, 0 }
   0xe   : > { %p645_p4 = por %p635_p1, %p76_p0  ;;  %p343_p5 = scmp.ge.s32.totalorder %s573_s19, 1 }
   0xf   : > { %p650_p6 = por %p134_p3, %p76_p0  ;;  %p141_p7 = scmp.lt.s32.totalorder %s573_s19, 3 }
  0x10   : > { %s827_s23 = scalar_select %p645_p4, 1, 0 }
  0x11   : > { %s828_s24 = scalar_select %p650_p6, 1, 0 }
  0x12   : > { %p655_p8 = pnand %p343_p5, %p141_p7  ;;  %s575_s26 = smov [#allocation6]  }
  0x13   : > { %s159_s27 = sshll.u32 %s575_s26, 4  ;;  %s30_s29 = sadd.s32 1, %s569_s18  ;;  %s160_s27 = int_to_ptr.vmem [resolvable:$true] %s159_s27 }
  0x14   : > { %s829_s25 = scalar_select %p655_p8, 1, 0 }
  0x15   : > { %p364_p10 = pneg %p655_p8  ;;  %s63_s30 = sadd.s32 1, %s561_s16 }
  0x16   : > { %p670_p12 = scmp.ge.s32.totalorder %s30_s29, 2  ;;  %s429_s7 = scalar_lea.hbm %s819_s2, 128 }
  0x17   : > { %p664_p11 = pnand %p364_p10, %p635_p1  ;;  %p430_p13 = scmp.ne.s32.totalorder %s819_s2, %s429_s7 }
  0x18   : > { %s831_s4 = scalar_select %p670_p12, 1, 0 }
  0x19   : > { %p431_p0 = pneg %p664_p11  ;;  %p436_p7 = scmp.lt.u32.totalorder %s429_s7, %s819_s2 }
  0x1b   : > { %p432_p3 = pnand %p431_p0, %p430_p13 }
  0x1d   : > { %p433_p5 = pneg %p432_p3 }
  0x1f   : > { %p438_p10 = pnand %p436_p7, %p433_p5 }
  0x21   : > { %441 = shalt.err (!%p438_p10)
}
  0x22   : > { %s442_s12 = scalar_lea.vmem %s160_s27, 128  ;;  %p450_p4 = scmp.lt.s32.totalorder %s160_s27, %s160_s27 }
  0x23   : > { %p443_p9 = scmp.ne.s32.totalorder %s160_s27, %s442_s12  ;;  %p451_p8 = scmp.lt.s32.totalorder %s442_s12, %s442_s12 }
  0x25   : > { %p445_p6 = pnand %p443_p9, %p431_p0  ;;  %p452_p2 = por %p451_p8, %p450_p4 }
  0x27   : > { %p446_p1 = pneg %p445_p6 }
  0x29   : > { %p453_p12 = pnand %p452_p2, %p446_p1 }
  0x2b   : > { %456 = shalt.err (!%p453_p12)
}
  0x2c   : > { %367 = dma.hbm_to_vmem [thread:$0]  (!%p664_p11), %s819_s2, 128, %s160_s27, [#allocation7]  }
  0x2d   : > { %p832_p4 = scmp.ne.s32.totalorder %s831_s4, 0  ;;  %p70_p1 = scmp.ne.s32.totalorder %s561_s16, %s557_s15 }
  0x2e   : > { %p71_p2 = scmp.eq.s32.totalorder %s573_s19, 0  ;;  %p377_p6 = scmp.lt.s32.totalorder %s573_s19, 2 }
  0x2f   : > { %s847_s29 = smov (%p832_p4, %s30_s29), 0  ;;  %p833_p12 = scmp.ne.s32.totalorder %s826_s22, 0 }
  0x30   : > { %s60_s20 = ssub.s32 %s569_s18, %s847_s29  ;;  %p72_p9 = por %p71_p2, %p70_p1 }
  0x31   : > { %p61_p8 = scmp.eq.s32.totalorder %s60_s20, 0  ;;  %p702_p13 = por %p833_p12, %p70_p1 }
  0x32   : > { %s170_s28 = sand.u32 1, %s561_s16   ;;  %s347_s4 = sshll.u32 %s569_s18, 7 }
  0x33   : > { %s710_s5 = scalar_select %p61_p8, %s561_s16, %s63_s30  }
  0x34   : > { %s346_s27 = sshll.u32 %s170_s28, 3  ;;  %s716_s8 = scalar_lea.hbm %s818_s1, %s347_s4 }
  0x35   : > { %s174_s22 = scalar_lea.vmem [#allocation3], %s346_s27  ;;  %p720_p11 = pnand %p377_p6, %p72_p9 }
  0x36   : > { %s182_s9 = sshll.u32 %s174_s22, 4  ;;  %s171_s30 = scalar_lea.sflag [#allocation4], %s170_s28  ;;  %s718_s9 = int_to_ptr.vmem [resolvable:$true] %s182_s9 }
  0x37   : > { %s457_s11 = scalar_lea.hbm %s716_s8, 128  ;;  %p459_p3 = pneg %p720_p11 }
  0x38   : > { %p458_p0 = scmp.ne.s32.totalorder %s716_s8, %s457_s11  ;;  %s462_s0 = scalar_lea.hbm %s818_s1, 256 }
  0x39   : > { %p463_p10 = scmp.lt.u32.totalorder %s716_s8, %s818_s1  ;;  %p464_p4 = scmp.lt.u32.totalorder %s462_s0, %s457_s11 }
  0x3a   : > { %p460_p5 = pnand %p459_p3, %p458_p0  ;;  %p466_p2 = scmp.lt.u32.totalorder %s457_s11, %s716_s8 }
  0x3b   : > { %p465_p1 = por %p464_p4, %p463_p10 }
  0x3c   : > { %p461_p7 = pneg %p460_p5 }
  0x3d   : > { %p467_p6 = por %p466_p2, %p465_p1 }
  0x3f   : > { %p468_p8 = pnand %p467_p6, %p461_p7 }
  0x41   : > { %471 = shalt.err (!%p468_p8)
}
  0x42   : > { %s472_s28 = scalar_lea.vmem %s718_s9, 128  ;;  %s576_s4 = smov [#allocation3]  }
  0x43   : > { %p473_p9 = scmp.ne.s32.totalorder %s718_s9, %s472_s28  ;;  %s477_s6 = sshll.u32 %s576_s4, 4  ;;  %s478_s6 = int_to_ptr.vmem [resolvable:$false] %s477_s6 }
  0x44   : > { %s479_s7 = scalar_lea.vmem %s478_s6, 256  ;;  %p480_p5 = scmp.lt.s32.totalorder %s718_s9, %s478_s6 }
  0x45   : > { %p475_p12 = pnand %p473_p9, %p459_p3  ;;  %p481_p10 = scmp.lt.s32.totalorder %s479_s7, %s472_s28 }
  0x47   : > { %p476_p0 = pneg %p475_p12  ;;  %p482_p4 = por %p481_p10, %p480_p5 }
  0x49   : > { %p483_p1 = pnand %p482_p4, %p476_p0 }
  0x4b   : > { %486 = shalt.err (!%p483_p1)
}
  0x4c   : > { %371 = dma.hbm_to_vmem [thread:$0]  (!%p720_p11), %s716_s8, 128, %s718_s9, %s171_s30  }
  0x4d   : > { %p836_p7 = scmp.ne.s32.totalorder %s829_s25, 0 }
  0x4e   : > { %s752_s22 = sand.u32 (!%p836_p7), 1, %s557_s15   ;;  %p837_p3 = scmp.ne.s32.totalorder (!%p836_p7), %s827_s23, 0 }
  0x4f   : > { %191 = sbr.rel (%p836_p7) target bundleno = 115 (0x73), region = 32  ;;  %s349_s11 = sshll.u32 (!%p836_p7), %s752_s22, 3 }
  0x50   : > { %s194_s12 = scalar_lea.sflag (!%p836_p7), [#allocation4], %s752_s22  ;;  %s197_s13 = scalar_lea.vmem (!%p836_p7), [#allocation3], %s349_s11 }
  0x56   : > { %540 = dma.done.wait (%p837_p3), %s194_s12, 128  }
  0x57   : > { %542 = vsyncadd (%p837_p3), %s194_s12, 4294967168  ;;  %p838_p2 = scmp.ne.s32.totalorder %s825_s21, 0 }
  0x59   : > { %544 = dma.done.wait (%p838_p2), [#allocation7], 128  }
  0x5a   : > { %546 = vsyncadd (%p838_p2), [#allocation7], 4294967168  ;;  %s226_s25 = sld [smem:[#allocation2]]  ;;  %v228_v0 = vld [vmem:[#allocation6] sm:$0xff]  ;;  %v227_v2 = vld [vmem:[%s197_s13] sm:$0xff]  ;;  %s223_s8 = scalar_lea.vmem [#allocation8], %s349_s11 }
  0x5b   : > { %s249_s9 = sshll.u32 %s223_s8, 4  ;;  %s353_s10 = sshll.u32 %s565_s17, 7  ;;  %vm232_vm0 = vcmask 261120   ;;  %s765_s9 = int_to_ptr.vmem [resolvable:$true] %s249_s9 }
  0x5c   : > { %s770_s21 = scalar_lea.hbm %s820_s3, %s353_s10  ;;  %s235_s0 = scalar_lea.sflag [#allocation5], %s752_s22 }
  0x5d   : > { %s487_s20 = scalar_lea.vmem %s765_s9, 128  ;;  %s577_s17 = smov [#allocation8]  }
  0x5e   : > { %p488_p11 = scmp.ne.s32.totalorder %s765_s9, %s487_s20  ;;  %s491_s27 = sshll.u32 %s577_s17, 4  ;;  %s492_s27 = int_to_ptr.vmem [resolvable:$false] %s491_s27 }
  0x5f   : > { %s493_s28 = scalar_lea.vmem %s492_s27, 256  ;;  %p494_p9 = scmp.lt.s32.totalorder %s765_s9, %s492_s27 }
  0x60   : > { %v229_v1 = vstv %s226_s25  ;;  %p489_p6 = pnand %p488_p11, %p702_p13  ;;  %p495_p12 = scmp.lt.s32.totalorder %s493_s28, %s487_s20 }
  0x61   : > { %v230_v3 = vmul.f32 %v229_v1, %v228_v0 }
  0x62   : > { %p490_p8 = pneg %p489_p6  ;;  %p496_p0 = por %p495_p12, %p494_p9 }
  0x63   : > { %v231_v4 = vadd.f32 %v230_v3, %v227_v2 }
  0x64   : > { %p497_p5 = pnand %p496_p0, %p490_p8 }
  0x65   : > { %233 = vst.msk [vmem:[%s223_s8] sm:$0xff] %vm232_vm0, %v231_v4 }
  0x66   : > { %500 = shalt.err (!%p497_p5)
}
  0x67   : > { %s501_s4 = scalar_lea.hbm %s770_s21, 128  ;;  %s505_s22 = scalar_lea.hbm %s820_s3, 256 }
  0x68   : > { %p502_p10 = scmp.ne.s32.totalorder %s770_s21, %s501_s4  ;;  %p506_p7 = scmp.lt.u32.totalorder %s770_s21, %s820_s3 }
  0x69   : > { %p507_p3 = scmp.lt.u32.totalorder %s505_s22, %s501_s4  ;;  %p509_p11 = scmp.lt.u32.totalorder %s501_s4, %s770_s21 }
  0x6a   : > { %p503_p4 = pnand %p502_p10, %p702_p13 }
  0x6b   : > { %p508_p2 = por %p507_p3, %p506_p7 }
  0x6c   : > { %p504_p1 = pneg %p503_p4 }
  0x6d   : > { %p510_p6 = por %p509_p11, %p508_p2 }
  0x6f   : > { %p511_p8 = pnand %p510_p6, %p504_p1 }
  0x71   : > { %514 = shalt.err (!%p511_p8)
}
  0x72   : > { %362 = dma.vmem_to_hbm [thread:$0]  (%p702_p13), %s765_s9, 128, %s770_s21, %s235_s0  }
  0x73 PF: > { %s261_s13 = sand.u32 1, %s553_s14   ;;  %p839_p9 = scmp.ne.s32.totalorder %s828_s24, 0 }
  0x74   : > { %p840_p12 = scmp.ge.s32.totalorder %s573_s19, 2  ;;  %s262_s25 = scalar_lea.sflag [#allocation5], %s261_s13 }
  0x76   : > { %p373_p0 = pnand %p840_p12, %p839_p9 }
  0x78   : > { %548 = dma.done.wait (!%p373_p0), %s262_s25, 128  }
  0x79   : > { %550 = vsyncadd (!%p373_p0), %s262_s25, 4294967168  ;;  %s21_s19 = sadd.s32 1, %s573_s19   ;;  %s841_s14 = smov %s557_s15 }
  0x7a   : > { %p18_p5 = scmp.ge.s32.totalorder %s21_s19, 4   ;;  %s842_s15 = smov %s561_s16 }
  0x7b   : > { %s843_s16 = smov %s710_s5  ;;  %s844_s17 = smov %s569_s18 }
  0x7c   : > { %s845_s18 = smov %s847_s29  ;;  %20 = sbr.rel (!%p18_p5) target bundleno = 9 (0x9), region = 82 }
  0x83   :  { %267 = vsyncpa [#allocation4], 1 }
  0x84   :  { %269 = vsyncpa [#allocation4 + $0x1], 1 }
  0x85   :  { %270 = vsyncpa [#allocation7], 1 }
  0x86   :  { %271 = vsyncpa [#allocation5], 1 }
  0x87   :  { %273 = vsyncpa [#allocation5 + $0x1], 1 }

</bundles_post_ra>
